<compile_context>
chip_gen: v7x
topology: tpu7x:2x2x1
jax: 0.10.0
libtpu: 0.0.40
codegen_flags: <defaults>
</compile_context>

<pallas_src>
import functools
import math
from typing import NamedTuple, Optional

import jax
import jax.numpy as jnp
from jax.experimental import pallas as pl
from jax.experimental.pallas import tpu as pltpu


NEG_SLOPE = 0.1


def _round_up(x, m):
    return (x + m - 1) // m * m


def _pick_tile(pad, target, step):
    """Largest multiple of `step` <= min(target, pad) that divides pad."""
    target = max(step, (target // step) * step)
    t = min(target, pad)
    t = max(step, (t // step) * step)
    while t > step and pad % t != 0:
        t -= step
    return max(t, step)


def _vmem_budget():
    """Generation-gated (tile_budget_bytes, vmem_limit_bytes)."""
    cap = None
    try:
        info = pltpu.get_tpu_info()
        cap = getattr(info, "vmem_capacity_bytes", None)
    except Exception:
        cap = None
    if cap is None:
        cap = 64 << 20                      # conservative: assume v7x-sized VMEM
    if cap >= (100 << 20):                  # v5e / v6e: 128 MiB physical
        tile_budget = 80 << 20
    else:                                   # v7x: 64 MiB physical
        tile_budget = 36 << 20
    vmem_limit = int(min(tile_budget + (12 << 20), cap - (8 << 20)))
    return tile_budget, vmem_limit


# --------------------------------------------------------------------------
# Kernels
# --------------------------------------------------------------------------
def _ff_kernel_fused_k(*refs, residual):
    """gk == 1: single dot per output tile, no accumulator scratch."""
    if residual:
        x_ref, wt_ref, b_ref, xres_ref, o_ref = refs
    else:
        x_ref, wt_ref, b_ref, o_ref = refs
        xres_ref = None
    xv = x_ref[...]
    wv = wt_ref[...]
    if xv.dtype != wv.dtype:
        xv = xv.astype(wv.dtype)            # per-tile cast (bf16 MXU path)
    y = jnp.dot(xv, wv, preferred_element_type=jnp.float32)
    y = y + b_ref[...].astype(jnp.float32)
    y = jnp.where(y >= 0, y, NEG_SLOPE * y)  # LeakyReLU(0.1)
    if residual:
        y = y + xres_ref[...].astype(jnp.float32)
    o_ref[...] = y.astype(o_ref.dtype)


def _ff_kernel_multi_k(*refs, residual):
    """gk > 1: resident f32 accumulator, epilogue fused into last k step."""
    if residual:
        x_ref, wt_ref, b_ref, xres_ref, o_ref, acc_ref = refs
    else:
        x_ref, wt_ref, b_ref, o_ref, acc_ref = refs
        xres_ref = None
    k = pl.program_id(2)
    xv = x_ref[...]
    wv = wt_ref[...]
    if xv.dtype != wv.dtype:
        xv = xv.astype(wv.dtype)
    part = jnp.dot(xv, wv, preferred_element_type=jnp.float32)

    @pl.when(k == 0)
    def _():
        acc_ref[...] = part                 # write-on-first-k (no zero + RMW)

    @pl.when(k > 0)
    def _():
        acc_ref[...] += part

    @pl.when(k == pl.num_programs(2) - 1)
    def _():
        y = acc_ref[...] + b_ref[...].astype(jnp.float32)
        y = jnp.where(y >= 0, y, NEG_SLOPE * y)
        if residual:
            y = y + xres_ref[...].astype(jnp.float32)
        o_ref[...] = y.astype(o_ref.dtype)


# --------------------------------------------------------------------------
# Parameter preparation (hoisted / cacheable weight transform)
# --------------------------------------------------------------------------
class FFParams(NamedTuple):
    wt: jax.Array      # (K_pad, N_pad) transposed, padded, cast to MXU dtype
    b: jax.Array       # (1, N_pad)
    n_inp: int
    n_out: int


def prepare_params(weight, bias, indices=None, *, mxu_dtype=jnp.bfloat16):
    """Gather/transpose/cast/pad the weight ONCE.  Cache & reuse across calls."""
    if indices is not None:
        weight = weight[indices]
        bias = bias[indices]
    n_out, n_inp = weight.shape
    K_pad = _round_up(n_inp, 128)
    N_pad = _round_up(n_out, 128)
    wt = weight.T                                       # (K, N)
    if mxu_dtype is not None:
        wt = wt.astype(mxu_dtype)
    if wt.shape != (K_pad, N_pad):
        wt = jnp.pad(wt, ((0, K_pad - n_inp), (0, N_pad - n_out)))
    b = bias if n_out == N_pad else jnp.pad(bias, (0, N_pad - n_out))
    return FFParams(wt=wt, b=b.reshape(1, N_pad), n_inp=n_inp, n_out=n_out)


# --------------------------------------------------------------------------
# Forward pass
# --------------------------------------------------------------------------
def feed_forward_prepared(x, params: FFParams, *, residual=False,
                          tm=512, tn=512, tk: Optional[int] = None):
    n_inp, n_out = params.n_inp, params.n_out
    if residual and n_out != n_inp:
        raise ValueError("residual requires n_out == n_inp (after indexing)")

    lead_shape = x.shape[:-1]
    K = x.shape[-1]
    assert K == n_inp, (K, n_inp)
    M = math.prod(lead_shape) if lead_shape else 1
    out_dtype = x.dtype
    K_pad, N_pad = params.wt.shape

    x_isz = jnp.dtype(x.dtype).itemsize
    w_isz = jnp.dtype(params.wt.dtype).itemsize
    out_isz = jnp.dtype(out_dtype).itemsize
    b_isz = jnp.dtype(params.b.dtype).itemsize

    # Sublane granularity of the MXU-input dtype (bf16 packs 16 rows / vreg).
    gran = 16 if w_isz == 2 else (32 if w_isz == 1 else 8)

    budget, vmem_limit = _vmem_budget()

    # ---- tile selection --------------------------------------------------
    tn = _pick_tile(N_pad, tn, 128)
    tm = max(gran, (min(tm, _round_up(M, gran)) // gran) * gran)
    M_pad = _round_up(M, tm)

    def tile_bytes(tk_, gk_):
        bts = 2 * tm * tk_ * x_isz          # x tiles (double-buffered)
        bts += 2 * tk_ * tn * w_isz         # W^T tiles
        bts += 2 * tm * tn * out_isz        # output tiles
        bts += 2 * tn * b_isz               # bias tile
        if residual:
            bts += 2 * tm * tn * x_isz      # residual view of x
        if gk_ > 1:
            bts += tm * tn * 4              # f32 accumulator scratch
        return bts

    tk_target = K_pad if tk is None else tk
    tk = _pick_tile(K_pad, tk_target, 128)
    while tile_bytes(tk, K_pad // tk) > budget and tk > 128:
        tk = _pick_tile(K_pad, tk - 128, 128)
    while tile_bytes(tk, K_pad // tk) > budget and tn > 128:
        tn = _pick_tile(N_pad, tn - 128, 128)
    while tile_bytes(tk, K_pad // tk) > budget and tm > gran:
        tm = max(gran, (tm // 2 // gran) * gran)
        M_pad = _round_up(M, tm)

    gm, gn, gk = M_pad // tm, N_pad // tn, K_pad // tk

    # v7x has 2 TensorCores; give the "parallel" axes >= 2 blocks when possible.
    if gm * gn == 1 and N_pad >= 256:
        tn = _pick_tile(N_pad, N_pad // 2, 128)
        gn = N_pad // tn

    # ---- pad the activation only when actually needed ---------------------
    x2d = x.reshape(M, K)
    if (M_pad, K_pad) != (M, K):
        x_pad = jnp.pad(x2d, ((0, M_pad - M), (0, K_pad - K)))
    else:
        x_pad = x2d

    # ---- specs / kernel --------------------------------------------------
    if gk == 1:
        in_specs = [
            pl.BlockSpec((tm, K_pad), lambda i, j: (i, 0)),     # x
            pl.BlockSpec((K_pad, tn), lambda i, j: (0, j)),     # W^T
            pl.BlockSpec((1, tn), lambda i, j: (0, j)),         # bias
        ]
        operands = [x_pad, params.wt, params.b]
        if residual:
            # Same buffer as x, viewed N-tiled (n_out == n_inp => N_pad == K_pad).
            in_specs.append(pl.BlockSpec((tm, tn), lambda i, j: (i, j)))
            operands.append(x_pad)
        kernel = functools.partial(_ff_kernel_fused_k, residual=residual)
        grid = (gm, gn)
        out_spec = pl.BlockSpec((tm, tn), lambda i, j: (i, j))
        scratch = []
        semantics = ("parallel", "parallel")
    else:
        in_specs = [
            pl.BlockSpec((tm, tk), lambda i, j, k: (i, k)),     # x
            pl.BlockSpec((tk, tn), lambda i, j, k: (k, j)),     # W^T
            pl.BlockSpec((1, tn), lambda i, j, k: (0, j)),      # bias
        ]
        operands = [x_pad, params.wt, params.b]
        if residual:
            in_specs.append(pl.BlockSpec((tm, tn), lambda i, j, k: (i, j)))
            operands.append(x_pad)
        kernel = functools.partial(_ff_kernel_multi_k, residual=residual)
        grid = (gm, gn, gk)
        out_spec = pl.BlockSpec((tm, tn), lambda i, j, k: (i, j))
        scratch = [pltpu.VMEM((tm, tn), jnp.float32)]
        semantics = ("parallel", "parallel", "arbitrary")

    # ---- scheduling hints (reflect actual re-streaming) -------------------
    bytes_accessed = (gn * M_pad * K_pad * x_isz       # x re-read per N tile
                      + gm * K_pad * N_pad * w_isz     # W^T re-read per M tile
                      + M_pad * N_pad * out_isz        # output written once
                      + gm * N_pad * b_isz)            # bias
    if residual:
        bytes_accessed += M_pad * N_pad * x_isz
    cost = pl.CostEstimate(flops=2 * M_pad * K_pad * N_pad,
                           transcendentals=0,
                           bytes_accessed=int(bytes_accessed))

    out_pad = pl.pallas_call(
        kernel,
        out_shape=jax.ShapeDtypeStruct((M_pad, N_pad), out_dtype),
        grid_spec=pltpu.PrefetchScalarGridSpec(
            num_scalar_prefetch=0,
            grid=grid,
            in_specs=in_specs,
            out_specs=out_spec,
            scratch_shapes=scratch,
        ),
        compiler_params=pltpu.CompilerParams(
            dimension_semantics=semantics,
            vmem_limit_bytes=vmem_limit,
        ),
        cost_estimate=cost,
    )(*operands)

    out = out_pad
    if (M_pad, N_pad) != (M, n_out):
        out = out_pad[:M, :n_out]
    return out.reshape(*lead_shape, n_out)


def feed_forward(x, weight, bias, indices=None, *, residual=False,
                 mxu_dtype=jnp.bfloat16, tm=512, tn=512, tk=None):
    """Convenience wrapper matching FeedForward.forward(x, indices)."""
    params = prepare_params(weight, bias, indices, mxu_dtype=mxu_dtype)
    return feed_forward_prepared(x, params, residual=residual,
                                 tm=tm, tn=tn, tk=tk)


# --------------------------------------------------------------------------
# Reference & tests
# --------------------------------------------------------------------------
def _reference(x, weight, bias, indices=None, residual=False):
    if indices is not None:
        weight = weight[indices]
        bias = bias[indices]
    y = x @ weight.T + bias
    y = jnp.where(y >= 0, y, NEG_SLOPE * y)
    if residual:
        y = y + x
    return y


if __name__ == "__main__":
    key = jax.random.PRNGKey(0)
    k_x, k_w, k_b, k_x2, k_w2, k_b2 = jax.random.split(key, 6)

    # ---- small shapes matching the module: batch=2, seq=8, n_inp=32, n_out=32
    batch, seq, n_inp, n_out = 2, 8, 32, 32
    x = jax.random.normal(k_x, (batch, seq, n_inp), dtype=jnp.float32)
    bound = 1.0 / (n_inp ** 0.5)
    weight = jax.random.uniform(k_w, (n_out, n_inp), jnp.float32, -bound, bound)
    bias = jax.random.uniform(k_b, (n_out,), jnp.float32, -bound, bound)

    y_ref = _reference(x, weight, bias, residual=False)

    # exact (f32 MXU inputs) path
    y = feed_forward(x, weight, bias, residual=False, mxu_dtype=None)
    jax.block_until_ready(y)
    assert y.shape == y_ref.shape
    assert jnp.allclose(y, y_ref, atol=1e-5, rtol=1e-5)

    # residual path (n_inp == n_out), exact inputs
    y_res = feed_forward(x, weight, bias, residual=True, mxu_dtype=None)
    jax.block_until_ready(y_res)
    y_res_ref = _reference(x, weight, bias, residual=True)
    assert jnp.allclose(y_res, y_res_ref, atol=1e-5, rtol=1e-5)

    # indices path: subset of output units (gather hoisted into prepare_params)
    idx = jnp.array([0, 3, 7, 12, 20, 25, 30, 31], dtype=jnp.int32)
    y_idx = feed_forward(x, weight, bias, indices=idx, residual=False,
                         mxu_dtype=None)
    jax.block_until_ready(y_idx)
    y_idx_ref = _reference(x, weight, bias, indices=idx, residual=False)
    assert y_idx.shape == y_idx_ref.shape
    assert jnp.allclose(y_idx, y_idx_ref, atol=1e-5, rtol=1e-5)

    # default bf16 MXU-input path (f32 accumulation), looser tolerance;
    # also exercises the prepared/cached-weight hot path twice.
    params_bf16 = prepare_params(weight, bias, mxu_dtype=jnp.bfloat16)
    y_bf16 = feed_forward_prepared(x, params_bf16, residual=False)
    y_bf16b = feed_forward_prepared(x, params_bf16, residual=False)
    jax.block_until_ready((y_bf16, y_bf16b))
    assert jnp.allclose(y_bf16, y_ref, atol=5e-2, rtol=5e-2)
    assert jnp.allclose(y_bf16, y_bf16b)

    # non-divisible / multi-tile path: forces gm=2, gn=2, gk=2 (multi-k kernel
    # with write-on-first-k accumulator) and zero-padding, exact f32 inputs.
    b2, s2, ni2, no2 = 3, 5, 256, 160
    x2 = jax.random.normal(k_x2, (b2, s2, ni2), dtype=jnp.float32)
    bound2 = 1.0 / (ni2 ** 0.5)
    w2 = jax.random.uniform(k_w2, (no2, ni2), jnp.float32, -bound2, bound2)
    bb2 = jax.random.uniform(k_b2, (no2,), jnp.float32, -bound2, bound2)
    y2 = feed_forward(x2, w2, bb2, residual=False, mxu_dtype=None,
                      tm=8, tn=128, tk=128)
    jax.block_until_ready(y2)
    y2_ref = _reference(x2, w2, bb2, residual=False)
    assert y2.shape == y2_ref.shape
    assert jnp.allclose(y2, y2_ref, atol=2e-4, rtol=2e-4)

    print("KERNEL_OK")
</pallas_src>

<mosaic_0001>
module attributes {stable_mosaic.version = 11 : i64} {
  func.func @_ff_kernel_fused_k(%arg0: i32, %arg1: i32, %arg2: memref<16x128xf32, #tpu.memory_space<vmem>>, %arg3: memref<128x128xf32, #tpu.memory_space<vmem>>, %arg4: memref<1x128xf32, #tpu.memory_space<vmem>>, %arg5: memref<16x128xf32, #tpu.memory_space<vmem>>) attributes {dimension_semantics = [#tpu.dimension_semantics<parallel>, #tpu.dimension_semantics<parallel>], iteration_bounds = array<i64: 1, 1>, scalar_prefetch = 0 : i64, scratch_operands = 0 : i64, tpu.core_type = #tpu.core_type<tc>, window_params = [{transform_indices = @transform_0, window_bounds = array<i64: 16, 128>}, {transform_indices = @transform_1, window_bounds = array<i64: 128, 128>}, {transform_indices = @transform_2, window_bounds = array<i64: 1, 128>}, {transform_indices = @transform_3, window_bounds = array<i64: 16, 128>}]} {
    %c0 = arith.constant 0 : index
    %c0_0 = arith.constant 0 : index
    %0 = vector.load %arg2[%c0, %c0_0] : memref<16x128xf32, #tpu.memory_space<vmem>>, vector<16x128xf32>
    %c0_1 = arith.constant 0 : index
    %c0_2 = arith.constant 0 : index
    %1 = vector.load %arg3[%c0_1, %c0_2] : memref<128x128xf32, #tpu.memory_space<vmem>>, vector<128x128xf32>
    %cst = arith.constant dense<0.000000e+00> : vector<16x128xf32>
    %2 = tpu.matmul %0, %1, %cst {dimension_numbers = #tpu.dot_dimension_numbers<[1], [0], [0], [1], [0, 0, 1, 1], [], []>} : vector<16x128xf32>, vector<128x128xf32>, vector<16x128xf32> -> vector<16x128xf32>
    %c0_3 = arith.constant 0 : index
    %c0_4 = arith.constant 0 : index
    %3 = vector.load %arg4[%c0_3, %c0_4] : memref<1x128xf32, #tpu.memory_space<vmem>>, vector<1x128xf32>
    %4 = vector.broadcast %3 : vector<1x128xf32> to vector<16x128xf32>
    %5 = arith.addf %2, %4 : vector<16x128xf32>
    %cst_5 = arith.constant 0.000000e+00 : f32
    %6 = vector.broadcast %cst_5 : f32 to vector<16x128xf32>
    %7 = arith.cmpf oge, %5, %6 : vector<16x128xf32>
    %cst_6 = arith.constant 1.000000e-01 : f32
    %8 = vector.broadcast %cst_6 : f32 to vector<16x128xf32>
    %9 = arith.mulf %8, %5 : vector<16x128xf32>
    %10 = arith.select %7, %5, %9 : vector<16x128xi1>, vector<16x128xf32>
    %c0_7 = arith.constant 0 : index
    %c0_8 = arith.constant 0 : index
    %11 = vector.load %arg5[%c0_7, %c0_8] : memref<16x128xf32, #tpu.memory_space<vmem>>, vector<16x128xf32>
    tpu.vector_store %arg5[%c0_7, %c0_8], %10 {strides = array<i32>} : memref<16x128xf32, #tpu.memory_space<vmem>>, vector<16x128xf32>,
    return
  }
  func.func @transform_0(%arg0: i32, %arg1: i32) -> (i32, i32) {
    %c0_i32 = arith.constant 0 : i32
    %c0_i32_0 = arith.constant 0 : i32
    return %arg0, %c0_i32 : i32, i32
  }
  func.func @transform_1(%arg0: i32, %arg1: i32) -> (i32, i32) {
    %c0_i32 = arith.constant 0 : i32
    %c0_i32_0 = arith.constant 0 : i32
    return %c0_i32, %arg1 : i32, i32
  }
  func.func @transform_2(%arg0: i32, %arg1: i32) -> (i32, i32) {
    %c0_i32 = arith.constant 0 : i32
    %c0_i32_0 = arith.constant 0 : i32
    return %c0_i32, %arg1 : i32, i32
  }
  func.func @transform_3(%arg0: i32, %arg1: i32) -> (i32, i32) {
    %c0_i32 = arith.constant 0 : i32
    return %arg0, %arg1 : i32, i32
  }
}

</mosaic_0001>

<bundles_post_ra>
// kernel: tpu_custom_call.1
= control target key start
LH: loop header
LB: loop body
LE: loop exit
PB: predicated region body
PF: predicated region fallthrough
CT: control target
= control target key end

     0   :  { %8 = vsyncpa [#allocation3], 0  ;;  %s405_s0 = inlined_call_operand.hbm [shape: f32[16,128], index: 0, kind: input, shape index: {}]   ;;  %s406_s1 = inlined_call_operand.hbm [shape: f32[128,128], index: 1, kind: input, shape index: {}]   ;;  %s407_s2 = inlined_call_operand.vmem [shape: f32[1,128], index: 2, kind: input, shape index: {}]   ;;  %s408_s3 = inlined_call_operand.hbm [shape: f32[16,128], index: 3, kind: output, shape index: {}]  }
   0x1   :  { %9 = vsyncpa [#allocation6], 0 }
   0x2   :  { %10 = vsyncpa [#allocation4], 0  ;;  %s332_s12 = smov [#allocation2]   ;;  %s260_s16 = scalar_lea.hbm %s405_s0, 256 }
   0x3   :  { %s16_s13 = sshll.u32 %s332_s12, 4  ;;  %p261_p0 = scmp.ne.s32.totalorder %s405_s0, %s260_s16  ;;  %s17_s13 = int_to_ptr.vmem [resolvable:$true] %s16_s13 }
   0x4   :  { %p264_p1 = scmp.lt.u32.totalorder %s260_s16, %s405_s0 }
   0x6   :  { %p266_p2 = pnand %p264_p1, %p261_p0 }
   0x8   :  { %269 = shalt.err (!%p266_p2)
}
   0x9   :  { %s270_s21 = scalar_lea.vmem %s17_s13, 256  ;;  %p275_p4 = scmp.lt.s32.totalorder %s17_s13, %s17_s13 }
   0xa   :  { %p271_p3 = scmp.ne.s32.totalorder %s17_s13, %s270_s21  ;;  %p276_p5 = scmp.lt.s32.totalorder %s270_s21, %s270_s21 }
   0xc   :  { %p277_p6 = por %p276_p5, %p275_p4 }
   0xe   :  { %p278_p7 = pnand %p277_p6, %p271_p3 }
  0x10   :  { %281 = shalt.err (!%p278_p7)
}
  0x11   :  { %s333_s22 = smov 128   ;;  %s334_s23 = smov 8  }
  0x12   :  { %22 = dma.hbm_to_vmem [thread:$0]  %s405_s0, 256, %s17_s13, [#allocation3], %s333_s22, %s333_s22, %s334_s23  }
  0x13   :  { %s335_s26 = smov [#allocation5]   ;;  %s282_s30 = scalar_lea.hbm %s406_s1, 2048 }
  0x14   :  { %s28_s27 = sshll.u32 %s335_s26, 4  ;;  %p283_p8 = scmp.ne.s32.totalorder %s406_s1, %s282_s30  ;;  %s29_s27 = int_to_ptr.vmem [resolvable:$true] %s28_s27 }
  0x15   :  { %p286_p9 = scmp.lt.u32.totalorder %s282_s30, %s406_s1 }
  0x17   :  { %p288_p10 = pnand %p286_p9, %p283_p8 }
  0x19   :  { %291 = shalt.err (!%p288_p10)
}
  0x1a   :  { %s292_s8 = scalar_lea.vmem %s29_s27, 2048  ;;  %p297_p12 = scmp.lt.s32.totalorder %s29_s27, %s29_s27 }
  0x1b   :  { %p293_p11 = scmp.ne.s32.totalorder %s29_s27, %s292_s8  ;;  %p298_p13 = scmp.lt.s32.totalorder %s292_s8, %s292_s8 }
  0x1d   :  { %p299_p0 = por %p298_p13, %p297_p12 }
  0x1f   :  { %p300_p1 = pnand %p299_p0, %p293_p11 }
  0x21   :  { %303 = shalt.err (!%p300_p1)
}
  0x22   :  { %34 = dma.hbm_to_vmem [thread:$0]  %s406_s1, 2048, %s29_s27, [#allocation6], %s333_s22, %s333_s22, %s334_s23  }
  0x23   :  { %326 = dma.done.wait [#allocation3], 256  }
  0x24   :  { %327 = vsyncadd [#allocation3], 4294967040 }
  0x25   :  { %328 = dma.done.wait [#allocation6], 2048  }
  0x26   :  { %329 = vsyncadd [#allocation6], 4294965248  ;;  %v45_v0 = vld [vmem:[#allocation5] sm:$0xff]  ;;  %v46_v1 = vld [vmem:[#allocation5 + $0x8] sm:$0xff]  ;;  %s336_s11 = smov [#allocation7]  }
  0x27   :  { %v47_v2 = vld [vmem:[#allocation5 + $0x10] sm:$0xff]  ;;  %v223_v3 = vpack.c.bf16 %v46_v1, %v45_v0  ;;  %v48_v4 = vld [vmem:[#allocation5 + $0x18] sm:$0xff]  ;;  %v49_v6 = vld [vmem:[#allocation5 + $0x20] sm:$0xff]  ;;  %s156_s12 = sshll.u32 %s336_s11, 4  ;;  %s157_s12 = int_to_ptr.vmem [resolvable:$true] %s156_s12 }
  0x28   :  { %v227_v5 = vpack.c.bf16 %v48_v4, %v47_v2  ;;  %v50_v7 = vld [vmem:[#allocation5 + $0x28] sm:$0xff]  ;;  %v43_v9 = vld [vmem:[#allocation2] sm:$0xff]  ;;  %v52_v11 = vld [vmem:[#allocation5 + $0x38] sm:$0xff]  ;;  %s304_s13 = scalar_lea.vmem %s157_s12, 256  ;;  %p309_p3 = scmp.lt.s32.totalorder %s157_s12, %s157_s12 }
  0x29   :  { %224 = vmatprep.subr.bf16.mxu0 %v223_v3  ;;  %v231_v8 = vpack.c.bf16 %v50_v7, %v49_v6  ;;  %v51_v10 = vld [vmem:[#allocation5 + $0x30] sm:$0xff]  ;;  %220 = vmatprep.mubr.f32.mxu0 %v43_v9  ;;  %v53_v13 = vld [vmem:[#allocation5 + $0x40] sm:$0xff]  ;;  %v54_v14 = vld [vmem:[#allocation5 + $0x48] sm:$0xff]  ;;  %p305_p2 = scmp.ne.s32.totalorder %s157_s12, %s304_s13  ;;  %p310_p4 = scmp.lt.s32.totalorder %s304_s13, %s304_s13 }
  0x2a   :  { %226 = vmatpush3.bf16.msra.mxu0 %v223_v3  ;;  %v235_v12 = vpack.c.bf16 %v52_v11, %v51_v10  ;;  %v239_v15 = vpack.c.bf16 %v54_v14, %v53_v13  ;;  %v55_v16 = vld [vmem:[#allocation5 + $0x50] sm:$0xff]  ;;  %v56_v17 = vld [vmem:[#allocation5 + $0x58] sm:$0xff]  ;;  %v57_v19 = vld [vmem:[#allocation5 + $0x60] sm:$0xff] }
  0x2b   :  { %228 = vmatprep.subr.bf16.mxu0 %v227_v5  ;;  %v243_v18 = vpack.c.bf16 %v56_v17, %v55_v16  ;;  %v58_v20 = vld [vmem:[#allocation5 + $0x68] sm:$0xff]  ;;  %v59_v22 = vld [vmem:[#allocation5 + $0x70] sm:$0xff]  ;;  %v60_v23 = vld [vmem:[#allocation5 + $0x78] sm:$0xff]  ;;  %p311_p5 = por %p310_p4, %p309_p3 }
  0x2c   :  { %v247_v21 = vpack.c.bf16 %v58_v20, %v57_v19  ;;  %v251_v24 = vpack.c.bf16 %v60_v23, %v59_v22  ;;  %v44_v25 = vld [vmem:[#allocation2 + $0x8] sm:$0xff]  ;;  %v169_v26 = vld [vmem:[%s407_s2] ss:$0 sm:$0xff] }
  0x2d   :  { %p312_p6 = pnand %p311_p5, %p305_p2 }
  0x2e   :  { %230 = vmatpush3.bf16.msra.mxu0 %v227_v5 }
  0x2f   :  { %232 = vmatprep.subr.bf16.mxu0 %v231_v8 }
  0x32   :  { %234 = vmatpush3.bf16.msra.mxu0 %v231_v8 }
  0x33   :  { %236 = vmatprep.subr.bf16.mxu0 %v235_v12 }
  0x36   :  { %238 = vmatpush3.bf16.msra.mxu0 %v235_v12 }
  0x37   :  { %240 = vmatprep.subr.bf16.mxu0 %v239_v15 }
  0x3a   :  { %242 = vmatpush3.bf16.msra.mxu0 %v239_v15 }
  0x3b   :  { %244 = vmatprep.subr.bf16.mxu0 %v243_v18 }
  0x3e   :  { %246 = vmatpush3.bf16.msra.mxu0 %v243_v18 }
  0x3f   :  { %248 = vmatprep.subr.bf16.mxu0 %v247_v21 }
  0x42   :  { %250 = vmatpush3.bf16.msra.mxu0 %v247_v21 }
  0x43   :  { %252 = vmatprep.subr.bf16.mxu0 %v251_v24 }
  0x46   :  { %254 = vmatpush3.bf16.msra.mxu0 %v251_v24 }
  0x49   :  { %221 = vmatmul.mubr.f32.vlgmr.msra.gmra.mrb[0].mxu0 %v44_v25 }
 0x11c   :  { %v222_v27 = vpop.f32.mrb[0].mxu0 }
 0x11d   :  { %v140_v28 = vadd.f32 %v222_v27, %v169_v26  ;;  %v134_v29 = vpop.f32.mrb[1].mxu0 }
 0x11e   :  { %v135_v30 = vadd.f32 %v169_v26, %v134_v29 }
 0x11f   :  { %vm144_vm0 = vcmp.ge.f32.partialorder %v140_v28, 0.0  ;;  %v146_v31 = vmul.f32 0.1, %v140_v28 }
 0x120   :  { %vm143_vm1 = vcmp.ge.f32.partialorder %v135_v30, 0.0  ;;  %v145_v32 = vmul.f32 0.1, %v135_v30 }
 0x121   :  { %v148_v33 = vsel %vm144_vm0, %v140_v28, %v146_v31 }
 0x122   :  { %v147_v34 = vsel %vm143_vm1, %v135_v30, %v145_v32  ;;  %150 = vst [vmem:[#allocation7 + $0x8] sm:$0xff] %v148_v33 }
 0x123   :  { %149 = vst [vmem:[#allocation7] sm:$0xff] %v147_v34 }
 0x124   :  { %315 = shalt.err (!%p312_p6)
}
 0x125   :  { %s316_s15 = scalar_lea.hbm %s408_s3, 256 }
 0x126   :  { %p317_p7 = scmp.ne.s32.totalorder %s408_s3, %s316_s15  ;;  %p320_p8 = scmp.lt.u32.totalorder %s316_s15, %s408_s3 }
 0x128   :  { %p322_p9 = pnand %p320_p8, %p317_p7 }
 0x12a   :  { %325 = shalt.err (!%p322_p9)
}
 0x12b   :  { %162 = dma.vmem_to_hbm [thread:$0]  %s157_s12, 256, %s408_s3, [#allocation4], %s333_s22, %s333_s22, %s334_s23  }
 0x12c   :  { %330 = dma.done.wait [#allocation4], 256  }
 0x12d   :  { %331 = vsyncadd [#allocation4], 4294967040 }
 0x12e   :  { %166 = vsyncpa [#allocation3], 1 }
 0x12f   :  { %167 = vsyncpa [#allocation6], 1 }
 0x130   :  { %168 = vsyncpa [#allocation4], 1 }

</bundles_post_ra>
